<compile_context>
chip_gen: v5e
topology: v5e:2x2
jax: 0.10.0
libtpu: 0.0.40
codegen_flags: <defaults>
</compile_context>

<pallas_src>
import jax
import jax.numpy as jnp
from jax.experimental import pallas as pl
from jax.experimental.pallas import tpu as pltpu


# ---------------------------------------------------------------------------
# Pallas kernel: one row-tile of nodes per grid step.
#   h      = X_tile @ W^T            (MXU, bf16 in / f32 acc)
#   cross  = A_top_tile @ H_top      (MXU, bf16 in / f32 acc)
#   o_tile = (1/deg)_tile * h + cross + b   (VPU)
# ---------------------------------------------------------------------------
def gcn_t2b_kernel(a_ref, x_ref, d_ref, ht_ref, w_ref, b_ref, o_ref):
    # a_ref : (TM, T_pad)    bf16  normalized top->bottom adjacency block rows
    # x_ref : (TM, F_in)     bf16  this tile's node features
    # d_ref : (TM, 1)        f32   exact self-loop scale 1/deg_i
    # ht_ref: (T_pad, F_out) bf16  projected top-node features  X_top @ W^T
    # w_ref : (F_in, F_out)  bf16  pre-transposed linear weight
    # b_ref : (1, F_out)     f32   bias
    # o_ref : (TM, F_out)    f32
    h = jnp.dot(x_ref[...], w_ref[...], preferred_element_type=jnp.float32)
    cross = jnp.dot(a_ref[...], ht_ref[...], preferred_element_type=jnp.float32)
    o_ref[...] = (d_ref[...] * h + cross + b_ref[...]).astype(o_ref.dtype)


def top_to_bottom_layer_pallas(embedding, edge_index, weight, bias,
                               num_top_nodes, *, tile_m=None):
    """GCNConv(in_size, out_size) forward for a top->bottom virtual-node layer.

    embedding     : (N, F_in)  float32 node features (bottom nodes + top virtual nodes)
    edge_index    : (2, E)     int32, row 0 = source (top virtual node), row 1 = target
    weight        : (F_out, F_in)  (nn.Linear layout)
    bias          : (F_out,)
    num_top_nodes : number of top virtual nodes; they occupy ids [N - num_top, N).
    """
    N, F_in = embedding.shape
    F_out = weight.shape[0]
    n_top = int(num_top_nodes)
    top_start = N - n_top

    # Structural precondition of this layer: all edge sources are top virtual
    # nodes (checked eagerly; the wrapper is not meant to be jitted here).
    assert bool(jnp.all(edge_index[0] >= top_start)), (
        "top_to_bottom edges must have top virtual nodes (ids >= N - num_top_nodes) as sources")

    # Row-tile choice: per-tile streamed bytes are ~1 KiB * tile_m, so VMEM is
    # never the constraint; keep >= 2 grid steps for megacore on small graphs.
    if tile_m is None:
        if N >= 4096:
            tile_m = 512
        elif N >= 512:
            tile_m = 256
        else:
            tile_m = 128
    n_tiles = pl.cdiv(N, tile_m)
    n_pad = n_tiles * tile_m
    t_pad = max(128, ((n_top + 127) // 128) * 128)   # lane-aligned MXU K dim

    # --- glue: PyG gcn_norm with self loops, in structured (diag + block) form
    src = edge_index[0]
    dst = edge_index[1]
    ew = jnp.ones(src.shape[0], dtype=jnp.float32)
    deg = jnp.ones((N,), jnp.float32).at[dst].add(ew)      # in-degree + self loop
    dis = jax.lax.rsqrt(deg)                               # deg >= 1 always
    d_self = 1.0 / deg                                     # self-loop coeff dis_i^2

    # Dense normalized top->bottom block: O(N * |top|), not O(N^2).
    norm = dis[src] * ew * dis[dst]
    a_top = jnp.zeros((n_pad, t_pad), jnp.float32).at[dst, src - top_start].add(norm)
    a_bf = a_top.astype(jnp.bfloat16)

    # Streamed per-row-tile operands (rows zero-padded; padded rows output only
    # `bias` and are sliced away below).
    x_bf = jnp.zeros((n_pad, F_in), jnp.bfloat16).at[:N].set(embedding.astype(jnp.bfloat16))
    d_pad = jnp.zeros((n_pad, 1), jnp.float32).at[:N, 0].set(d_self)

    # Grid-invariant operands (all tiny; resident in VMEM).
    w_t = weight.T.astype(jnp.bfloat16)                    # (F_in, F_out)
    bias2d = bias.reshape(1, F_out).astype(jnp.float32)
    h_top = embedding[top_start:] @ weight.T               # (|top|, F_out) once, f32
    ht_bf = jnp.zeros((t_pad, F_out), jnp.bfloat16).at[:n_top].set(h_top.astype(jnp.bfloat16))

    flops = 2 * n_pad * F_in * F_out + 2 * n_pad * t_pad * F_out
    bytes_accessed = (a_bf.size * 2 + x_bf.size * 2 + d_pad.size * 4
                      + ht_bf.size * 2 + w_t.size * 2 + bias2d.size * 4
                      + n_pad * F_out * 4)

    # Explicit scoped-VMEM budget computed from the actual buffers (resident
    # operands + double-buffered streamed tiles + double-buffered output).
    resident = ht_bf.size * 2 + w_t.size * 2 + bias2d.size * 4
    per_tile = tile_m * (t_pad * 2 + F_in * 2 + 4 + F_out * 4)
    vmem_limit = int(min(max(4 * (resident + per_tile) + (4 << 20), 32 << 20), 64 << 20))

    out = pl.pallas_call(
        gcn_t2b_kernel,
        out_shape=jax.ShapeDtypeStruct((n_pad, F_out), jnp.float32),
        grid_spec=pltpu.PrefetchScalarGridSpec(
            num_scalar_prefetch=0,
            grid=(n_tiles,),
            in_specs=[
                pl.BlockSpec((tile_m, t_pad), lambda i: (i, 0)),   # A_top row tile (streamed)
                pl.BlockSpec((tile_m, F_in), lambda i: (i, 0)),    # X row tile (streamed)
                pl.BlockSpec((tile_m, 1), lambda i: (i, 0)),       # 1/deg row tile (streamed)
                pl.BlockSpec((t_pad, F_out), lambda i: (0, 0)),    # H_top (grid-invariant)
                pl.BlockSpec((F_in, F_out), lambda i: (0, 0)),     # W^T  (grid-invariant)
                pl.BlockSpec((1, F_out), lambda i: (0, 0)),        # bias (grid-invariant)
            ],
            out_specs=pl.BlockSpec((tile_m, F_out), lambda i: (i, 0)),
        ),
        compiler_params=pltpu.CompilerParams(
            dimension_semantics=("parallel",),
            vmem_limit_bytes=vmem_limit,
        ),
        cost_estimate=pl.CostEstimate(
            flops=flops, transcendentals=0, bytes_accessed=bytes_accessed),
    )(a_bf, x_bf, d_pad, ht_bf, w_t, bias2d)

    return out[:N]


# Pure-JAX f32 reference for verification (dense PyG GCNConv semantics).
def _reference(embedding, edge_index, weight, bias):
    N = embedding.shape[0]
    self_loops = jnp.arange(N, dtype=edge_index.dtype)
    row = jnp.concatenate([edge_index[0], self_loops])
    col = jnp.concatenate([edge_index[1], self_loops])
    ew = jnp.ones(row.shape[0], dtype=jnp.float32)
    deg = jnp.zeros((N,), jnp.float32).at[col].add(ew)
    dis = jnp.where(deg > 0, jax.lax.rsqrt(deg), 0.0)
    norm = dis[row] * ew * dis[col]
    h = embedding @ weight.T
    msg = h[row] * norm[:, None]
    out = jnp.zeros((N, weight.shape[0]), jnp.float32).at[col].add(msg)
    return out + bias[None, :]


if __name__ == "__main__":
    # Small, deterministic problem: 256 nodes (240 bottom + 16 top virtual),
    # in_size = out_size = 128, 512 top->bottom edges.
    N, F_IN, F_OUT, E, N_TOP = 256, 128, 128, 512, 16

    key = jax.random.PRNGKey(0)
    k_x, k_src, k_dst, k_w, k_b = jax.random.split(key, 5)

    embedding = jax.random.normal(k_x, (N, F_IN), dtype=jnp.float32)
    # top-to-bottom edges: sources are "top" virtual nodes (last 16 ids),
    # targets are "bottom" nodes (first 240 ids).
    src = jax.random.randint(k_src, (E,), N - N_TOP, N, dtype=jnp.int32)
    dst = jax.random.randint(k_dst, (E,), 0, N - N_TOP, dtype=jnp.int32)
    edge_index = jnp.stack([src, dst], axis=0)

    # Deterministic parameter init (shapes from GCNConv(in_size, out_size)).
    weight = jax.random.normal(k_w, (F_OUT, F_IN), dtype=jnp.float32) * (1.0 / jnp.sqrt(F_IN))
    bias = jax.random.normal(k_b, (F_OUT,), dtype=jnp.float32) * 0.01

    out = top_to_bottom_layer_pallas(embedding, edge_index, weight, bias, N_TOP)
    out = jax.block_until_ready(out)

    ref = _reference(embedding, edge_index, weight, bias)
    assert out.shape == (N, F_OUT)
    # bf16 MXU inputs with f32 accumulation -> tolerance loosened accordingly.
    assert jnp.allclose(out, ref, atol=5e-2, rtol=5e-2), float(jnp.max(jnp.abs(out - ref)))

    print("KERNEL_OK")
</pallas_src>

<mosaic_0001>
module attributes {stable_mosaic.version = 11 : i64} {
  func.func @gcn_t2b_kernel(%arg0: i32, %arg1: memref<128x128xbf16, #tpu.memory_space<vmem>>, %arg2: memref<128x128xbf16, #tpu.memory_space<vmem>>, %arg3: memref<128x1xf32, #tpu.memory_space<vmem>>, %arg4: memref<128x128xbf16, #tpu.memory_space<vmem>>, %arg5: memref<128x128xbf16, #tpu.memory_space<vmem>>, %arg6: memref<1x128xf32, #tpu.memory_space<vmem>>, %arg7: memref<128x128xf32, #tpu.memory_space<vmem>>) attributes {dimension_semantics = [#tpu.dimension_semantics<parallel>], iteration_bounds = array<i64: 2>, scalar_prefetch = 0 : i64, scratch_operands = 0 : i64, tpu.core_type = #tpu.core_type<tc>, window_params = [{transform_indices = @transform_0, window_bounds = array<i64: 128, 128>}, {transform_indices = @transform_1, window_bounds = array<i64: 128, 128>}, {transform_indices = @transform_2, window_bounds = array<i64: 128, 1>}, {pipeline_mode = #tpu.pipeline_mode<synchronous>, transform_indices = @transform_3, window_bounds = array<i64: 128, 128>}, {pipeline_mode = #tpu.pipeline_mode<synchronous>, transform_indices = @transform_4, window_bounds = array<i64: 128, 128>}, {pipeline_mode = #tpu.pipeline_mode<synchronous>, transform_indices = @transform_5, window_bounds = array<i64: 1, 128>}, {transform_indices = @transform_6, window_bounds = array<i64: 128, 128>}]} {
    %c0 = arith.constant 0 : index
    %c0_0 = arith.constant 0 : index
    %0 = vector.load %arg2[%c0, %c0_0] : memref<128x128xbf16, #tpu.memory_space<vmem>>, vector<128x128xbf16>
    %c0_1 = arith.constant 0 : index
    %c0_2 = arith.constant 0 : index
    %1 = vector.load %arg5[%c0_1, %c0_2] : memref<128x128xbf16, #tpu.memory_space<vmem>>, vector<128x128xbf16>
    %cst = arith.constant dense<0.000000e+00> : vector<128x128xf32>
    %2 = tpu.matmul %0, %1, %cst {dimension_numbers = #tpu.dot_dimension_numbers<[1], [0], [0], [1], [0, 0, 1, 1], [], []>} : vector<128x128xbf16>, vector<128x128xbf16>, vector<128x128xf32> -> vector<128x128xf32>
    %c0_3 = arith.constant 0 : index
    %c0_4 = arith.constant 0 : index
    %3 = vector.load %arg1[%c0_3, %c0_4] : memref<128x128xbf16, #tpu.memory_space<vmem>>, vector<128x128xbf16>
    %c0_5 = arith.constant 0 : index
    %c0_6 = arith.constant 0 : index
    %4 = vector.load %arg4[%c0_5, %c0_6] : memref<128x128xbf16, #tpu.memory_space<vmem>>, vector<128x128xbf16>
    %cst_7 = arith.constant dense<0.000000e+00> : vector<128x128xf32>
    %5 = tpu.matmul %3, %4, %cst_7 {dimension_numbers = #tpu.dot_dimension_numbers<[1], [0], [0], [1], [0, 0, 1, 1], [], []>} : vector<128x128xbf16>, vector<128x128xbf16>, vector<128x128xf32> -> vector<128x128xf32>
    %c0_8 = arith.constant 0 : index
    %c0_9 = arith.constant 0 : index
    %6 = vector.load %arg3[%c0_8, %c0_9] : memref<128x1xf32, #tpu.memory_space<vmem>>, vector<128x1xf32>
    %7 = vector.broadcast %6 : vector<128x1xf32> to vector<128x128xf32>
    %8 = arith.mulf %7, %2 : vector<128x128xf32>
    %9 = arith.addf %8, %5 : vector<128x128xf32>
    %c0_10 = arith.constant 0 : index
    %c0_11 = arith.constant 0 : index
    %10 = vector.load %arg6[%c0_10, %c0_11] : memref<1x128xf32, #tpu.memory_space<vmem>>, vector<1x128xf32>
    %11 = vector.broadcast %10 : vector<1x128xf32> to vector<128x128xf32>
    %12 = arith.addf %9, %11 : vector<128x128xf32>
    %c0_12 = arith.constant 0 : index
    %c0_13 = arith.constant 0 : index
    %13 = vector.load %arg7[%c0_12, %c0_13] : memref<128x128xf32, #tpu.memory_space<vmem>>, vector<128x128xf32>
    tpu.vector_store %arg7[%c0_12, %c0_13], %12 {strides = array<i32>} : memref<128x128xf32, #tpu.memory_space<vmem>>, vector<128x128xf32>,
    return
  }
  func.func @transform_0(%arg0: i32) -> (i32, i32) {
    %c0_i32 = arith.constant 0 : i32
    %c0_i32_0 = arith.constant 0 : i32
    return %arg0, %c0_i32 : i32, i32
  }
  func.func @transform_1(%arg0: i32) -> (i32, i32) {
    %c0_i32 = arith.constant 0 : i32
    %c0_i32_0 = arith.constant 0 : i32
    return %arg0, %c0_i32 : i32, i32
  }
  func.func @transform_2(%arg0: i32) -> (i32, i32) {
    %c0_i32 = arith.constant 0 : i32
    %c0_i32_0 = arith.constant 0 : i32
    return %arg0, %c0_i32 : i32, i32
  }
  func.func @transform_3(%arg0: i32) -> (i32, i32) {
    %c0_i32 = arith.constant 0 : i32
    %c0_i32_0 = arith.constant 0 : i32
    %c0_i32_1 = arith.constant 0 : i32
    return %c0_i32, %c0_i32_0 : i32, i32
  }
  func.func @transform_4(%arg0: i32) -> (i32, i32) {
    %c0_i32 = arith.constant 0 : i32
    %c0_i32_0 = arith.constant 0 : i32
    %c0_i32_1 = arith.constant 0 : i32
    return %c0_i32, %c0_i32_0 : i32, i32
  }
  func.func @transform_5(%arg0: i32) -> (i32, i32) {
    %c0_i32 = arith.constant 0 : i32
    %c0_i32_0 = arith.constant 0 : i32
    %c0_i32_1 = arith.constant 0 : i32
    return %c0_i32, %c0_i32_0 : i32, i32
  }
  func.func @transform_6(%arg0: i32) -> (i32, i32) {
    %c0_i32 = arith.constant 0 : i32
    %c0_i32_0 = arith.constant 0 : i32
    return %arg0, %c0_i32 : i32, i32
  }
}

</mosaic_0001>

<bundles_post_ra>
// kernel: tpu_custom_call.1
= control target key start
LH: loop header
LB: loop body
LE: loop exit
PB: predicated region body
PF: predicated region fallthrough
CT: control target
= control target key end

     0   :  { %11 = vsyncpa [#allocation3], 0  ;;  %s1623_s0 = inlined_call_operand.vmem [shape: bf16[256,128], index: 0, kind: input, shape index: {}]   ;;  %s1624_s1 = inlined_call_operand.vmem [shape: bf16[256,128], index: 1, kind: input, shape index: {}]   ;;  %s1625_s2 = inlined_call_operand.vmem [shape: f32[256,1], index: 2, kind: input, shape index: {}]   ;;  %s1626_s3 = inlined_call_operand.hbm [shape: bf16[128,128], index: 3, kind: input, shape index: {}]   ;;  %s1627_s4 = inlined_call_operand.hbm [shape: bf16[128,128], index: 4, kind: input, shape index: {}]   ;;  %s1628_s5 = inlined_call_operand.vmem [shape: f32[1,128], index: 5, kind: input, shape index: {}]   ;;  %s1629_s6 = inlined_call_operand.hbm [shape: f32[256,128], index: 6, kind: output, shape index: {}]  }
   0x1   :  { %12 = vsyncpa [#allocation6], 0 }
   0x2   :  { %13 = vsyncpa [#allocation4], 0 }
   0x3   :  { %15 = vsyncpa [#allocation4 + $0x1], 0  ;;  %s1413_s21 = smov 0   ;;  %s1415_s22 = smov 0  }
   0x4   :  { %s1417_s23 = smov 0   ;;  %s1419_s24 = smov 0  }
   0x5 LB: > { %s1434_s25 = sadd.s32 4294967295, %s1369_s24   ;;  %s973_s26 = sadd.s32 4294967294, %s1369_s24   ;;  %s1369_s24 = sphi %s1419_s24, %s1636_s24   ;;  %s1365_s23 = sphi %s1417_s23, %s1635_s23   ;;  %s1361_s22 = sphi %s1415_s22, %s1634_s22   ;;  %s1357_s21 = sphi %s1413_s21, %s1633_s21  }
   0x6   : > { %s1438_s27 = sadd.s32 1, %s1369_s24   ;;  %s169_s28 = sadd.s32 1, %s1365_s23 }
   0x7   : > { %s166_s29 = ssub.s32 %s1369_s24, %s1438_s27  ;;  %p179_p0 = scmp.ne.s32.totalorder %s1365_s23, %s1361_s22 }
   0x8   : > { %p167_p1 = scmp.eq.s32.totalorder %s166_s29, 0  ;;  %p180_p2 = scmp.eq.s32.totalorder %s1434_s25, 1 }
   0x9   : > { %p185_p3 = scmp.ne.s32.totalorder %s1361_s22, %s1357_s21  ;;  %p186_p4 = scmp.eq.s32.totalorder %s973_s26, 1 }
   0xa   : > { %s1449_s30 = scalar_select %p167_p1, %s1365_s23, %s169_s28  }
   0xb   : > { %p1451_p5 = por %p180_p2, %p179_p0  ;;  %p1455_p6 = por %p186_p4, %p185_p3 }
   0xc   : > { %p974_p7 = scmp.ge.s32.totalorder %s1369_s24, 1  ;;  %p193_p8 = scmp.lt.s32.totalorder %s1369_s24, 3 }
   0xd   : > { %p1191_p9 = scmp.eq.s32.totalorder %s1434_s25, 0  ;;  %s204_s12 = sshll.u32 %s1626_s3, 4  ;;  %s205_s12 = int_to_ptr.hbm [resolvable:$true] %s204_s12 }
   0xe   : > { %p1462_p10 = pnand %p974_p7, %p193_p8  ;;  %s1371_s13 = smov [#allocation2]  }
   0xf   : > { %s206_s14 = sshll.u32 %s1371_s13, 4  ;;  %s218_s17 = sshll.u32 %s1627_s4, 4  ;;  %s207_s14 = int_to_ptr.vmem [resolvable:$true] %s206_s14  ;;  %s219_s17 = int_to_ptr.hbm [resolvable:$true] %s218_s17 }
  0x10   : > { %p1180_p11 = pneg %p1462_p10  ;;  %s1372_s18 = smov 64  }
  0x11   : > { %s1373_s19 = smov 4   ;;  %s1374_s20 = smov [#allocation5]  }
  0x12   : > { %p1181_p12 = pnand %p1191_p9, %p1180_p11  ;;  %s220_s26 = sshll.u32 %s1374_s20, 4  ;;  %s221_s26 = int_to_ptr.vmem [resolvable:$true] %s220_s26 }
  0x13   : > { %266 = sbr.rel (%p1462_p10) target bundleno = 259 (0x103), region = 44 }
  0x14   : > { %1183 = dma.hbm_to_vmem [thread:$0]  (!%p1181_p12), %s205_s12, 1024, %s207_s14, [#allocation3], %s1372_s18, %s1372_s18, %s1373_s19  }
  0x15   : > { %1186 = dma.hbm_to_vmem [thread:$0]  (!%p1181_p12), %s219_s17, 1024, %s221_s26, [#allocation6], %s1372_s18, %s1372_s18, %s1373_s19  }
  0x18   : > { %1344 = dma.done.wait (%p1191_p9), [#allocation3], 1024  }
  0x19   : > { %1346 = vsyncadd (%p1191_p9), [#allocation3], 4294966272 }
  0x1a   : > { %1348 = dma.done.wait (%p1191_p9), [#allocation6], 1024  }
  0x1b   : > { %1350 = vsyncadd (%p1191_p9), [#allocation6], 4294966272  ;;  %s982_s28 = sshll.u32 %s1434_s25, 4  ;;  %v1375_v0 = vmov 0   ;;  %v1136_v1 = vld [vmem:[#allocation5 + $0x38] sm:$0xff]  ;;  %v1135_v3 = vld [vmem:[#allocation5 + $0x30] sm:$0xff] }
  0x1c   : > { %1235 = vset.pattern.permute.xlu0 %v1375_v0  ;;  %p313_p13 = scmp.lt.s32.totalorder %s982_s28, 31  ;;  %1236 = vset.pattern.permute.xlu1 %v1375_v0  ;;  %v1152_v2 = vld [vmem:[#allocation2 + $0x38] sm:$0xff]  ;;  %v1151_v4 = vld [vmem:[#allocation2 + $0x30] sm:$0xff]  ;;  %v1134_v6 = vld [vmem:[#allocation5 + $0x28] sm:$0xff]  ;;  %s309_s19 = sand.u32 1, %s1361_s22  }
  0x1d   : > { %1237 = vset.pattern.permute.xlu2 %v1375_v0  ;;  %459 = vmatpush.bf16.msra.mxu0 %v1136_v1  ;;  %v1150_v7 = vld [vmem:[#allocation2 + $0x28] sm:$0xff]  ;;  %v1133_v9 = vld [vmem:[#allocation5 + $0x20] sm:$0xff]  ;;  %v1132_v12 = vld [vmem:[#allocation5 + $0x18] sm:$0xff]  ;;  %s981_s20 = sshll.u32 %s309_s19, 7  ;;  %s1153_s9 = sshll.u32 %s1434_s25, 7 }
  0x1e   : > { %s1638_s28 = smov (!%p313_p13, %s982_s28), 31  ;;  %1154 = vmatpush.bf16.msra.mxu2 %v1136_v1  ;;  %636 = vmatpush.bf16.msra.mxu1 %v1152_v2  ;;  %v1149_v11 = vld [vmem:[#allocation2 + $0x20] sm:$0xff]  ;;  %v1148_v13 = vld [vmem:[#allocation2 + $0x18] sm:$0xff]  ;;  %v1131_v14 = vld [vmem:[#allocation5 + $0x10] sm:$0xff]  ;;  %s850_s14 = scalar_lea.sflag [#allocation4], %s309_s19 }
  0x1f   : > { %s987_s29 = sshll.u32 %s1638_s28, 3  ;;  %1162 = vmatpush.bf16.msra.mxu3 %v1152_v2  ;;  %v1147_v18 = vld [vmem:[#allocation2 + $0x10] sm:$0xff]  ;;  %v1130_v19 = vld [vmem:[#allocation5 + $0x8] sm:$0xff]  ;;  %s983_s12 = sshll.u32 %s1638_s28, 2  ;;  %v1129_v22 = vld [vmem:[#allocation5] sm:$0xff] }
  0x20   : > { %s1493_s11 = scalar_lea.vmem %s1625_s2, %s987_s29  ;;  %v1146_v20 = vld [vmem:[#allocation2 + $0x8] sm:$0xff]  ;;  %s1506_s15 = scalar_lea.vmem %s1624_s1, %s983_s12  ;;  %v1145_v24 = vld [vmem:[#allocation2] sm:$0xff] }
  0x21   : > { %v685_v5 = vld [vmem:[%s1493_s11] sm:$0xff]  ;;  %460 = vmatpush.bf16.msra.mxu0 %v1135_v3  ;;  %v687_v8 = vld [vmem:[%s1493_s11 + $0x10] sm:$0xff]  ;;  %v686_v10 = vld [vmem:[%s1493_s11 + $0x8] sm:$0xff]  ;;  %s1512_s18 = scalar_lea.vmem %s1623_s0, %s983_s12  ;;  %s1551_s29 = scalar_lea.vmem [#allocation7], %s981_s20 }
  0x22   : > { %703 = vperm.xlu0 %1235, %v685_v5   ;;  %1155 = vmatpush.bf16.msra.mxu2 %v1135_v3  ;;  %v691_v15 = vld [vmem:[%s1493_s11 + $0x30] sm:$0xff]  ;;  %v688_v16 = vld [vmem:[%s1493_s11 + $0x18] sm:$0xff]  ;;  %v689_v17 = vld [vmem:[%s1493_s11 + $0x20] sm:$0xff]  ;;  %s861_s12 = scalar_lea.hbm %s1629_s6, %s1153_s9  ;;  %s862_s13 = sshll.u32 %s1551_s29, 4  ;;  %s863_s13 = int_to_ptr.vmem [resolvable:$true] %s862_s13 }
  0x23   : > { %637 = vmatpush.bf16.msra.mxu1 %v1151_v4  ;;  %1163 = vmatpush.bf16.msra.mxu3 %v1151_v4  ;;  %v692_v21 = vld [vmem:[%s1493_s11 + $0x38] sm:$0xff]  ;;  %v694_v23 = vld [vmem:[%s1493_s11 + $0x48] sm:$0xff]  ;;  %v1121_v25 = vld [vmem:[%s1506_s15] sm:$0xff]  ;;  %s864_s25 = sshll.u32 %s861_s12, 4  ;;  %s1319_s20 = scalar_lea.hbm %s1629_s6, 256  ;;  %s865_s25 = int_to_ptr.hbm [resolvable:$true] %s864_s25 }
  0x24   : > { %713 = vperm.xlu1 %1236, %v687_v8   ;;  %723 = vperm.xlu2 %1237, %v689_v17   ;;  %v1125_v26 = vld [vmem:[%s1506_s15 + $0x20] sm:$0xff]  ;;  %v690_v30 = vld [vmem:[%s1493_s11 + $0x28] sm:$0xff]  ;;  %v695_v31 = vld [vmem:[%s1493_s11 + $0x50] sm:$0xff] }
  0x25   : > { %461 = vmatpush.bf16.msra.mxu0 %v1134_v6  ;;  %v1137_v27 = vld [vmem:[%s1512_s18] sm:$0xff]  ;;  %v698_v33 = vld [vmem:[%s1493_s11 + $0x68] sm:$0xff]  ;;  %v700_v34 = vld [vmem:[%s1493_s11 + $0x78] sm:$0xff] }
  0x26   : > { %1156 = vmatpush.bf16.msra.mxu2 %v1134_v6  ;;  %v1141_v28 = vld [vmem:[%s1512_s18 + $0x20] sm:$0xff]  ;;  %v1122_v35 = vld [vmem:[%s1506_s15 + $0x8] sm:$0xff]  ;;  %v696_v39 = vld [vmem:[%s1493_s11 + $0x58] sm:$0xff] }
  0x27   : > { %638 = vmatpush.bf16.msra.mxu1 %v1150_v7  ;;  %1164 = vmatpush.bf16.msra.mxu3 %v1150_v7  ;;  %v697_v29 = vld [vmem:[%s1493_s11 + $0x60] sm:$0xff]  ;;  %v1126_v36 = vld [vmem:[%s1506_s15 + $0x28] sm:$0xff]  ;;  %v699_v40 = vld [vmem:[%s1493_s11 + $0x70] sm:$0xff] }
  0x28   : > { %v693_v32 = vld [vmem:[%s1493_s11 + $0x40] sm:$0xff]  ;;  %v1138_v37 = vld [vmem:[%s1512_s18 + $0x8] sm:$0xff]  ;;  %v1123_v41 = vld [vmem:[%s1506_s15 + $0x10] sm:$0xff] }
  0x29   : > { %462 = vmatpush.bf16.msra.mxu0 %v1133_v9  ;;  %v1142_v38 = vld [vmem:[%s1512_s18 + $0x28] sm:$0xff]  ;;  %v1127_v42 = vld [vmem:[%s1506_s15 + $0x30] sm:$0xff]  ;;  %v1124_v45 = vld [vmem:[%s1506_s15 + $0x18] sm:$0xff] }
  0x2a   : > { %708 = vperm.xlu0 %1235, %v686_v10   ;;  %1157 = vmatpush.bf16.msra.mxu2 %v1133_v9  ;;  %v1139_v43 = vld [vmem:[%s1512_s18 + $0x10] sm:$0xff]  ;;  %v1128_v46 = vld [vmem:[%s1506_s15 + $0x38] sm:$0xff]  ;;  %v1546_v58 = vld [vmem:[%s1628_s5] ss:$0 sm:$0xff]  ;;  %s1313_s15 = sshra.s32 %s865_s25, 4  ;;  %s1314_s15 = int_to_ptr.hbm [resolvable:$true] %s1313_s15 }
  0x2b   : > { %639 = vmatpush.bf16.msra.mxu1 %v1149_v11  ;;  %1165 = vmatpush.bf16.msra.mxu3 %v1149_v11  ;;  %v1143_v44 = vld [vmem:[%s1512_s18 + $0x30] sm:$0xff]  ;;  %v1140_v47 = vld [vmem:[%s1512_s18 + $0x18] sm:$0xff]  ;;  %s1315_s16 = scalar_lea.hbm %s1314_s15, 128  ;;  %p1320_p3 = scmp.lt.s32.totalorder %s1314_s15, %s1629_s6 }
  0x2c   : > { %718 = vperm.xlu1 %1236, %v688_v16   ;;  %728 = vperm.xlu2 %1237, %v690_v30   ;;  %v1144_v48 = vld [vmem:[%s1512_s18 + $0x38] sm:$0xff]  ;;  %p1316_p0 = scmp.ne.s32.totalorder %s1314_s15, %s1315_s16  ;;  %p1321_p4 = scmp.lt.s32.totalorder %s1319_s20, %s1315_s16 }
  0x2d   : > { %463 = vmatpush.bf16.msra.mxu0 %v1132_v12 }
  0x2e   : > { %1158 = vmatpush.bf16.msra.mxu2 %v1132_v12  ;;  %p1317_p1 = pnand %p1316_p0, %p1451_p5  ;;  %p1322_p7 = por %p1321_p4, %p1320_p3 }
  0x2f   : > { %640 = vmatpush.bf16.msra.mxu1 %v1148_v13  ;;  %1166 = vmatpush.bf16.msra.mxu3 %v1148_v13 }
  0x30   : > { %p1318_p2 = pneg %p1317_p1 }
  0x31   : > { %464 = vmatpush.bf16.msra.mxu0 %v1131_v14 }
  0x32   : > { %733 = vperm.xlu0 %1235, %v691_v15   ;;  %1159 = vmatpush.bf16.msra.mxu2 %v1131_v14  ;;  %p1323_p8 = pnand %p1322_p7, %p1318_p2 }
  0x33   : > { %641 = vmatpush.bf16.msra.mxu1 %v1147_v18  ;;  %1167 = vmatpush.bf16.msra.mxu3 %v1147_v18 }
  0x34   : > { %738 = vperm.xlu1 %1236, %v692_v21   ;;  %743 = vperm.xlu2 %1237, %v693_v32  }
  0x35   : > { %465 = vmatpush.bf16.msra.mxu0 %v1130_v19 }
  0x36   : > { %1160 = vmatpush.bf16.msra.mxu2 %v1130_v19 }
  0x37   : > { %642 = vmatpush.bf16.msra.mxu1 %v1146_v20  ;;  %1168 = vmatpush.bf16.msra.mxu3 %v1146_v20 }
  0x39   : > { %466 = vmatpush.bf16.msra.mxu0 %v1129_v22 }
  0x3a   : > { %748 = vperm.xlu0 %1235, %v694_v23   ;;  %1161 = vmatpush.bf16.msra.mxu2 %v1129_v22 }
  0x3b   : > { %643 = vmatpush.bf16.msra.mxu1 %v1145_v24  ;;  %1169 = vmatpush.bf16.msra.mxu3 %v1145_v24 }
  0x3c   : > { %467 = vmatmul.bf16.vlgmr.msra.gmra.mxu0 %v1121_v25  ;;  %753 = vperm.xlu1 %1236, %v695_v31  }
  0x3d   : > { %487 = vmatmul.bf16.vlgmr.msra.gmra.mxu2 %v1125_v26  ;;  %758 = vperm.xlu2 %1237, %v696_v39  }
  0x3e   : > { %644 = vmatmul.bf16.vlgmr.msra.gmra.mxu1 %v1137_v27  ;;  %664 = vmatmul.bf16.vlgmr.msra.gmra.mxu3 %v1141_v28 }
  0x42   : > { %763 = vperm.xlu0 %1235, %v697_v29  }
  0x44   : > { %768 = vperm.xlu1 %1236, %v698_v33  }
  0x45   : > { %773 = vperm.xlu2 %1237, %v699_v40  }
  0x4a   : > { %778 = vperm.xlu0 %1235, %v700_v34  }
  0x4c   : > { %472 = vmatmul.bf16.gmra.mxu0 %v1122_v35 }
  0x4d   : > { %492 = vmatmul.bf16.gmra.mxu2 %v1126_v36 }
  0x4e   : > { %649 = vmatmul.bf16.gmra.mxu1 %v1138_v37  ;;  %669 = vmatmul.bf16.gmra.mxu3 %v1142_v38 }
  0x5c   : > { %477 = vmatmul.bf16.gmra.mxu0 %v1123_v41 }
  0x5d   : > { %497 = vmatmul.bf16.gmra.mxu2 %v1127_v42 }
  0x5e   : > { %654 = vmatmul.bf16.gmra.mxu1 %v1139_v43  ;;  %674 = vmatmul.bf16.gmra.mxu3 %v1143_v44 }
  0x6c   : > { %482 = vmatmul.bf16.gmra.mxu0 %v1124_v45 }
  0x6d   : > { %502 = vmatmul.bf16.gmra.mxu2 %v1128_v46 }
  0x6e   : > { %659 = vmatmul.bf16.gmra.mxu1 %v1140_v47  ;;  %679 = vmatmul.bf16.gmra.mxu3 %v1144_v48 }
  0x7e   : > { %v724_v50 = vpop.permute.xlu2 %723 }
  0x86   : > { %v1538_v53 = vpop.permute.xlu2 %728 }
  0x8e   : > { %v744_v61 = vpop.permute.xlu2 %743 }
  0x94   : > { %v704_v49 = vpop.permute.xlu0 %703 }
  0x96   : > { %v714_v51 = vpop.permute.xlu1 %713 }
  0x97   : > { %v759_v32 = vpop.permute.xlu2 %758 }
  0x9c   : > { %v709_v52 = vpop.permute.xlu0 %708 }
  0x9e   : > { %v719_v55 = vpop.permute.xlu1 %718 }
  0xa4   : > { %v1548_v60 = vpop.permute.xlu0 %733 }
  0xa6   : > { %v1554_v6 = vpop.permute.xlu1 %738 }
  0xac   : > { %v749_v10 = vpop.permute.xlu0 %748 }
  0xae   : > { %v754_v20 = vpop.permute.xlu1 %753 }
  0xb4   : > { %v764_v43 = vpop.permute.xlu0 %763 }
  0xb9   : > { %v468_v54 = vpop.f32.mrf.mxu0 }
  0xba   : > { %v781_v56 = vmul.f32 %v704_v49, %v468_v54 }
  0xbb   : > { %v645_v57 = vpop.f32.mrf.mxu1 }
  0xbc   : > { %v797_v59 = vadd.f32 %v781_v56, %v645_v57 }
  0xbe   : > { %v817_v62 = vadd.f32 %v1546_v58, %v797_v59 }
  0xc0   : > { %v488_v63 = vpop.f32.mrf.mxu2  ;;  %833 = vst [vmem:[%s1551_s29] sm:$0xff] %v817_v62 }
  0xc1   : > { %v789_v0 = vmul.f32 %v744_v61, %v488_v63  ;;  %v665_v1 = vpop.f32.mrf.mxu3  ;;  %v470_v2 = vpop.f32.mrf.mxu0 }
  0xc2   : > { %v782_v4 = vmul.f32 %v709_v52, %v470_v2 }
  0xc3   : > { %v805_v3 = vadd.f32 %v789_v0, %v665_v1  ;;  %v647_v5 = vpop.f32.mrf.mxu1 }
  0xc4   : > { %v798_v8 = vadd.f32 %v782_v4, %v647_v5 }
  0xc5   : > { %v825_v7 = vadd.f32 %v1546_v58, %v805_v3  ;;  %v774_v3 = vpop.permute.xlu2 %773 }
  0xc6   : > { %v818_v9 = vadd.f32 %v1546_v58, %v798_v8 }
  0xc7   : > { %841 = vst [vmem:[%s1551_s29 + $0x40] sm:$0xff] %v825_v7 }
  0xc8   : > { %v490_v11 = vpop.f32.mrf.mxu2  ;;  %834 = vst [vmem:[%s1551_s29 + $0x8] sm:$0xff] %v818_v9 }
  0xc9   : > { %v790_v12 = vmul.f32 %v749_v10, %v490_v11  ;;  %v667_v13 = vpop.f32.mrf.mxu3  ;;  %v473_v14 = vpop.f32.mrf.mxu0 }
  0xca   : > { %v783_v16 = vmul.f32 %v714_v51, %v473_v14  ;;  %v779_v14 = vpop.permute.xlu0 %778 }
  0xcb   : > { %v806_v15 = vadd.f32 %v790_v12, %v667_v13  ;;  %v650_v17 = vpop.f32.mrf.mxu1 }
  0xcc   : > { %v799_v19 = vadd.f32 %v783_v16, %v650_v17 }
  0xcd   : > { %v826_v18 = vadd.f32 %v1546_v58, %v806_v15 }
  0xce   : > { %v819_v21 = vadd.f32 %v1546_v58, %v799_v19 }
  0xcf   : > { %842 = vst [vmem:[%s1551_s29 + $0x48] sm:$0xff] %v826_v18 }
  0xd0   : > { %v493_v22 = vpop.f32.mrf.mxu2  ;;  %835 = vst [vmem:[%s1551_s29 + $0x10] sm:$0xff] %v819_v21 }
  0xd1   : > { %v791_v23 = vmul.f32 %v754_v20, %v493_v22  ;;  %v670_v24 = vpop.f32.mrf.mxu3  ;;  %v475_v25 = vpop.f32.mrf.mxu0 }
  0xd2   : > { %v784_v27 = vmul.f32 %v719_v55, %v475_v25  ;;  %v769_v55 = vpop.permute.xlu1 %768 }
  0xd3   : > { %v807_v26 = vadd.f32 %v791_v23, %v670_v24  ;;  %v652_v28 = vpop.f32.mrf.mxu1 }
  0xd4   : > { %v800_v30 = vadd.f32 %v784_v27, %v652_v28 }
  0xd5   : > { %v827_v29 = vadd.f32 %v1546_v58, %v807_v26 }
  0xd6   : > { %v820_v31 = vadd.f32 %v1546_v58, %v800_v30 }
  0xd7   : > { %843 = vst [vmem:[%s1551_s29 + $0x50] sm:$0xff] %v827_v29 }
  0xd8   : > { %v495_v33 = vpop.f32.mrf.mxu2  ;;  %836 = vst [vmem:[%s1551_s29 + $0x18] sm:$0xff] %v820_v31 }
  0xd9   : > { %v792_v34 = vmul.f32 %v759_v32, %v495_v33  ;;  %v672_v35 = vpop.f32.mrf.mxu3  ;;  %v478_v36 = vpop.f32.mrf.mxu0 }
  0xda   : > { %v785_v38 = vmul.f32 %v724_v50, %v478_v36 }
  0xdb   : > { %v808_v37 = vadd.f32 %v792_v34, %v672_v35  ;;  %v655_v39 = vpop.f32.mrf.mxu1 }
  0xdc   : > { %v801_v41 = vadd.f32 %v785_v38, %v655_v39 }
  0xdd   : > { %v828_v40 = vadd.f32 %v1546_v58, %v808_v37 }
  0xde   : > { %v821_v42 = vadd.f32 %v1546_v58, %v801_v41 }
  0xdf   : > { %844 = vst [vmem:[%s1551_s29 + $0x58] sm:$0xff] %v828_v40 }
  0xe0   : > { %v498_v44 = vpop.f32.mrf.mxu2  ;;  %837 = vst [vmem:[%s1551_s29 + $0x20] sm:$0xff] %v821_v42 }
  0xe1   : > { %v793_v45 = vmul.f32 %v764_v43, %v498_v44  ;;  %v675_v46 = vpop.f32.mrf.mxu3  ;;  %v480_v47 = vpop.f32.mrf.mxu0 }
  0xe2   : > { %v786_v49 = vmul.f32 %v1538_v53, %v480_v47 }
  0xe3   : > { %v809_v48 = vadd.f32 %v793_v45, %v675_v46  ;;  %v657_v51 = vpop.f32.mrf.mxu1 }
  0xe4   : > { %v802_v52 = vadd.f32 %v786_v49, %v657_v51 }
  0xe5   : > { %v829_v50 = vadd.f32 %v1546_v58, %v809_v48 }
  0xe6   : > { %v822_v54 = vadd.f32 %v1546_v58, %v802_v52 }
  0xe7   : > { %845 = vst [vmem:[%s1551_s29 + $0x60] sm:$0xff] %v829_v50 }
  0xe8   : > { %v500_v56 = vpop.f32.mrf.mxu2  ;;  %838 = vst [vmem:[%s1551_s29 + $0x28] sm:$0xff] %v822_v54 }
  0xe9   : > { %v794_v57 = vmul.f32 %v769_v55, %v500_v56  ;;  %v677_v59 = vpop.f32.mrf.mxu3  ;;  %v483_v61 = vpop.f32.mrf.mxu0 }
  0xea   : > { %v787_v63 = vmul.f32 %v1548_v60, %v483_v61 }
  0xeb   : > { %v810_v62 = vadd.f32 %v794_v57, %v677_v59  ;;  %v660_v53 = vpop.f32.mrf.mxu1 }
  0xec   : > { %v803_v1 = vadd.f32 %v787_v63, %v660_v53 }
  0xed   : > { %v830_v0 = vadd.f32 %v1546_v58, %v810_v62 }
  0xee   : > { %v823_v2 = vadd.f32 %v1546_v58, %v803_v1 }
  0xef   : > { %846 = vst [vmem:[%s1551_s29 + $0x68] sm:$0xff] %v830_v0 }
  0xf0   : > { %v503_v4 = vpop.f32.mrf.mxu2  ;;  %839 = vst [vmem:[%s1551_s29 + $0x30] sm:$0xff] %v823_v2 }
  0xf1   : > { %v795_v5 = vmul.f32 %v774_v3, %v503_v4  ;;  %v680_v7 = vpop.f32.mrf.mxu3  ;;  %v485_v8 = vpop.f32.mrf.mxu0 }
  0xf2   : > { %v788_v10 = vmul.f32 %v1554_v6, %v485_v8 }
  0xf3   : > { %v811_v9 = vadd.f32 %v795_v5, %v680_v7  ;;  %v662_v60 = vpop.f32.mrf.mxu1 }
  0xf4   : > { %v804_v12 = vadd.f32 %v788_v10, %v662_v60 }
  0xf5   : > { %v831_v11 = vadd.f32 %v1546_v58, %v811_v9 }
  0xf6   : > { %v824_v13 = vadd.f32 %v1546_v58, %v804_v12 }
  0xf7   : > { %847 = vst [vmem:[%s1551_s29 + $0x70] sm:$0xff] %v831_v11 }
  0xf8   : > { %v505_v15 = vpop.f32.mrf.mxu2  ;;  %840 = vst [vmem:[%s1551_s29 + $0x38] sm:$0xff] %v824_v13 }
  0xf9   : > { %v796_v16 = vmul.f32 %v779_v14, %v505_v15  ;;  %v682_v6 = vpop.f32.mrf.mxu3 }
  0xfb   : > { %v812_v17 = vadd.f32 %v796_v16, %v682_v6 }
  0xfd   : > { %v832_v18 = vadd.f32 %v1546_v58, %v812_v17 }
  0xff   : > { %848 = vst [vmem:[%s1551_s29 + $0x78] sm:$0xff] %v832_v18 }
 0x100   : > { %1326 = shalt.err (!%p1323_p8)
}
 0x101   : > { %s1376_s19 = smov 128   ;;  %s1377_s29 = smov 8  }
 0x102   : > { %1178 = dma.vmem_to_hbm [thread:$0]  (%p1451_p5), %s863_s13, 2048, %s865_s25, %s850_s14, %s1376_s19, %s1376_s19, %s1377_s29  }
 0x103 PF: > { %p1195_p9 = scmp.ge.s32.totalorder %s1369_s24, 2  ;;  %s879_s9 = sand.u32 1, %s1357_s21  }
 0x104   : > { %s880_s10 = scalar_lea.sflag [#allocation4], %s879_s9 }
 0x105   : > { %p1188_p10 = pnand %p1195_p9, %p1455_p6 }
 0x107   : > { %p1189_p11 = pneg %p1188_p10 }
 0x109   : > { %1352 = dma.done.wait (%p1189_p11), %s880_s10, 2048  }
 0x10a   : > { %1354 = vsyncadd (%p1189_p11), %s880_s10, 4294965248  ;;  %p18_p12 = scmp.ge.s32.totalorder %s1438_s27, 4   ;;  %s1633_s21 = smov %s1361_s22 }
 0x10b   : > { %s1634_s22 = smov %s1365_s23  ;;  %s1635_s23 = smov %s1449_s30 }
 0x10c   : > { %s1636_s24 = smov %s1438_s27  ;;  %20 = sbr.rel (!%p18_p12) target bundleno = 5 (0x5), region = 94 }
 0x111   :  { %886 = vsyncpa [#allocation3], 1 }
 0x112   :  { %888 = vsyncpa [#allocation3 + $0x1], 1 }
 0x113   :  { %889 = vsyncpa [#allocation6], 1 }
 0x114   :  { %890 = vsyncpa [#allocation4], 1 }
 0x115   :  { %892 = vsyncpa [#allocation4 + $0x1], 1 }

</bundles_post_ra>
